<compile_context>
chip_gen: v5e
topology: v5e:2x2
jax: 0.10.0
libtpu: 0.0.40
codegen_flags: <defaults>
</compile_context>

<pallas_src>
import jax
import jax.numpy as jnp
from jax.experimental import pallas as pl
from jax.experimental.pallas import tpu as pltpu


def _sphere_kernel(x_ref, o_ref):
    # x_ref / o_ref: (TILE_ROWS, FEAT) block in VMEM, full feature axis.
    x = x_ref[...].astype(jnp.float32)
    # Sum of squares along the lane (last) axis, keepdims for broadcast.
    sq_sum = jnp.sum(x * x, axis=-1, keepdims=True)
    # rsqrt on the narrow (TILE_ROWS, 1) column, then a cheap VPU multiply.
    inv_norm = jax.lax.rsqrt(sq_sum)
    o_ref[...] = (x * inv_norm).astype(o_ref.dtype)


def _sublane_multiple(dtype) -> int:
    itemsize = jnp.dtype(dtype).itemsize
    if itemsize >= 4:
        return 8
    if itemsize == 2:
        return 16
    return 32


def _round_up(x: int, m: int) -> int:
    return ((x + m - 1) // m) * m


def _choose_tile_rows(rows: int, feat: int, dtype) -> int:
    """Pick a row-tile: ~1 MiB of f32 compute per block, capped at 1024 rows,
    aligned to the dtype's native sublane packing, and no (much) larger than
    the actual row count."""
    mult = _sublane_multiple(dtype)
    target_block_bytes = 1 << 20  # ~1 MiB of f32 per block
    tile = target_block_bytes // (feat * 4)
    tile = max(mult, (tile // mult) * mult)
    tile = min(tile, 1024)
    # Don't pick a tile far bigger than the number of rows we actually have.
    tile = min(tile, _round_up(rows, mult))
    return max(tile, mult)


def sphere(x, dim=-1, tile_rows=None):
    """x / x.norm(dim=dim, keepdim=True), computed in a Pallas TPU kernel.

    Only dim=-1 (the PyTorch module's default) is supported; other dims would
    just be a transpose in the wrapper.
    Note: all-zero rows produce Inf/NaN, matching PyTorch's x / x.norm().
    """
    assert dim in (-1, x.ndim - 1), "kernel normalizes along the last axis"
    orig_shape = x.shape
    feat = orig_shape[-1]
    rows = 1
    for d in orig_shape[:-1]:
        rows *= d
    x2d = x.reshape(rows, feat)

    if tile_rows is None:
        tile_rows = _choose_tile_rows(rows, feat, x.dtype)

    grid = (pl.cdiv(rows, tile_rows),)

    out2d = pl.pallas_call(
        _sphere_kernel,
        out_shape=jax.ShapeDtypeStruct((rows, feat), x.dtype),
        grid_spec=pltpu.PrefetchScalarGridSpec(
            num_scalar_prefetch=0,
            grid=grid,
            in_specs=[pl.BlockSpec((tile_rows, feat), lambda i: (i, 0))],
            out_specs=pl.BlockSpec((tile_rows, feat), lambda i: (i, 0)),
        ),
        compiler_params=pltpu.CompilerParams(
            dimension_semantics=("parallel",),
            vmem_limit_bytes=32 << 20,
        ),
    )(x2d)

    return out2d.reshape(orig_shape)


if __name__ == "__main__":
    key = jax.random.PRNGKey(0)

    # Case 1: lane-aligned feature dim (typical parametrized weight shape).
    x1 = jax.random.normal(key, (2, 4, 16, 128), dtype=jnp.float32)
    out1 = jax.block_until_ready(sphere(x1))
    ref1 = x1 / jnp.linalg.norm(x1, axis=-1, keepdims=True)
    assert out1.shape == x1.shape
    assert jnp.allclose(out1, ref1, atol=1e-5, rtol=1e-5), "mismatch (case 1)"

    # Case 2: ragged row count and non-128 feature dim (exercises the
    # ragged last grid block, no padding path in the wrapper).
    key2 = jax.random.fold_in(key, 1)
    x2 = jax.random.normal(key2, (6, 37, 96), dtype=jnp.float32)
    out2 = jax.block_until_ready(sphere(x2))
    ref2 = x2 / jnp.linalg.norm(x2, axis=-1, keepdims=True)
    assert out2.shape == x2.shape
    assert jnp.allclose(out2, ref2, atol=1e-5, rtol=1e-5), "mismatch (case 2)"

    print("KERNEL_OK")
</pallas_src>

<mosaic_0001>
module attributes {stable_mosaic.version = 11 : i64} {
  func.func @_sphere_kernel(%arg0: i32, %arg1: memref<128x128xf32, #tpu.memory_space<vmem>>, %arg2: memref<128x128xf32, #tpu.memory_space<vmem>>) attributes {dimension_semantics = [#tpu.dimension_semantics<parallel>], iteration_bounds = array<i64: 1>, scalar_prefetch = 0 : i64, scratch_operands = 0 : i64, tpu.core_type = #tpu.core_type<tc>, window_params = [{transform_indices = @transform_0, window_bounds = array<i64: 128, 128>}, {transform_indices = @transform_1, window_bounds = array<i64: 128, 128>}]} {
    %c0 = arith.constant 0 : index
    %c0_0 = arith.constant 0 : index
    %0 = vector.load %arg1[%c0, %c0_0] : memref<128x128xf32, #tpu.memory_space<vmem>>, vector<128x128xf32>
    %1 = arith.mulf %0, %0 : vector<128x128xf32>
    %cst = arith.constant dense<0.000000e+00> : vector<128xf32>
    %2 = vector.multi_reduction <add>, %1, %cst [1] : vector<128x128xf32> to vector<128xf32>
    %3 = vector.shape_cast %2 : vector<128xf32> to vector<128x1xf32>
    %4 = math.rsqrt %3 : vector<128x1xf32>
    %5 = vector.broadcast %4 : vector<128x1xf32> to vector<128x128xf32>
    %6 = arith.mulf %0, %5 : vector<128x128xf32>
    %c0_1 = arith.constant 0 : index
    %c0_2 = arith.constant 0 : index
    %7 = vector.load %arg2[%c0_1, %c0_2] : memref<128x128xf32, #tpu.memory_space<vmem>>, vector<128x128xf32>
    tpu.vector_store %arg2[%c0_1, %c0_2], %6 {strides = array<i32>} : memref<128x128xf32, #tpu.memory_space<vmem>>, vector<128x128xf32>,
    return
  }
  func.func @transform_0(%arg0: i32) -> (i32, i32) {
    %c0_i32 = arith.constant 0 : i32
    %c0_i32_0 = arith.constant 0 : i32
    return %arg0, %c0_i32 : i32, i32
  }
  func.func @transform_1(%arg0: i32) -> (i32, i32) {
    %c0_i32 = arith.constant 0 : i32
    %c0_i32_0 = arith.constant 0 : i32
    return %arg0, %c0_i32 : i32, i32
  }
}

</mosaic_0001>

<bundles_post_ra>
// kernel: tpu_custom_call.1
= control target key start
LH: loop header
LB: loop body
LE: loop exit
PB: predicated region body
PF: predicated region fallthrough
CT: control target
= control target key end

     0   :  { %6 = vsyncpa [#allocation3], 0  ;;  %s630_s0 = inlined_call_operand.hbm [shape: f32[128,128], index: 0, kind: input, shape index: {}]   ;;  %s631_s1 = inlined_call_operand.hbm [shape: f32[128,128], index: 1, kind: output, shape index: {}]  }
   0x1   :  { %7 = vsyncpa [#allocation4], 0  ;;  %s12_s8 = sshll.u32 %s630_s0, 4  ;;  %s388_s9 = smov [#allocation2]   ;;  %s13_s8 = int_to_ptr.hbm [resolvable:$true] %s12_s8 }
   0x2   :  { %s14_s10 = sshll.u32 %s388_s9, 4  ;;  %s389_s11 = smov 128   ;;  %s15_s10 = int_to_ptr.vmem [resolvable:$true] %s14_s10 }
   0x3   :  { %s390_s12 = smov 8  }
   0x4   :  { %20 = dma.hbm_to_vmem [thread:$0]  %s13_s8, 2048, %s15_s10, [#allocation3], %s389_s11, %s389_s11, %s390_s12  }
   0x5   :  { %384 = dma.done.wait [#allocation3], 2048  }
   0x6   :  { %385 = vsyncadd [#allocation3], 4294965248  ;;  %v408_v0 = vld [vmem:[#allocation2 + $0x20] sm:$0xff]  ;;  %v410_v1 = vld [vmem:[#allocation2 + $0x10] sm:$0xff]  ;;  %s391_s0 = smov [#allocation5]   ;;  %s287_s16 = sshll.u32 %s631_s1, 4  ;;  %s288_s16 = int_to_ptr.hbm [resolvable:$true] %s287_s16 }
   0x7   :  { %v412_v2 = vld [vmem:[#allocation2] sm:$0xff]  ;;  %v45_v3 = vmul.f32 %v408_v0, %v408_v0  ;;  %v43_v4 = vmul.f32 %v410_v1, %v410_v1  ;;  %v420_v6 = vld [vmem:[#allocation2 + $0x28] sm:$0xff]  ;;  %v422_v7 = vld [vmem:[#allocation2 + $0x18] sm:$0xff]  ;;  %s285_s13 = sshll.u32 %s391_s0, 4  ;;  %s286_s13 = int_to_ptr.vmem [resolvable:$true] %s285_s13 }
   0x8   :  { %v41_v5 = vmul.f32 %v412_v2, %v412_v2  ;;  %v424_v8 = vld [vmem:[#allocation2 + $0x8] sm:$0xff]  ;;  %v46_v9 = vmul.f32 %v420_v6, %v420_v6  ;;  %v44_v10 = vmul.f32 %v422_v7, %v422_v7  ;;  %v432_v12 = vld [vmem:[#allocation2 + $0x40] sm:$0xff]  ;;  %v434_v13 = vld [vmem:[#allocation2 + $0x38] sm:$0xff] }
   0x9   :  { %65 = vadd.xlane.f32.xlu2 %v45_v3  ;;  %61 = vadd.xlane.f32.xlu1 %v43_v4  ;;  %v42_v11 = vmul.f32 %v424_v8, %v424_v8  ;;  %v436_v14 = vld [vmem:[#allocation2 + $0x30] sm:$0xff]  ;;  %v49_v15 = vmul.f32 %v432_v12, %v432_v12  ;;  %v48_v16 = vmul.f32 %v434_v13, %v434_v13  ;;  %v444_v18 = vld [vmem:[#allocation2 + $0x58] sm:$0xff]  ;;  %v448_v20 = vld [vmem:[#allocation2 + $0x48] sm:$0xff] }
   0xa   :  { %57 = vadd.xlane.f32.xlu0 %v41_v5  ;;  %v47_v17 = vmul.f32 %v436_v14, %v436_v14  ;;  %v446_v19 = vld [vmem:[#allocation2 + $0x50] sm:$0xff]  ;;  %v52_v21 = vmul.f32 %v444_v18, %v444_v18  ;;  %v50_v23 = vmul.f32 %v448_v20, %v448_v20  ;;  %v458_v25 = vld [vmem:[#allocation2 + $0x68] sm:$0xff]  ;;  %v460_v26 = vld [vmem:[#allocation2 + $0x60] sm:$0xff] }
   0xb   :  { %v51_v22 = vmul.f32 %v446_v19, %v446_v19  ;;  %v456_v24 = vld [vmem:[#allocation2 + $0x70] sm:$0xff]  ;;  %v54_v28 = vmul.f32 %v458_v25, %v458_v25  ;;  %v53_v29 = vmul.f32 %v460_v26, %v460_v26  ;;  %v468_v30 = vld [vmem:[#allocation2 + $0x78] sm:$0xff] }
   0xc   :  { %v55_v27 = vmul.f32 %v456_v24, %v456_v24  ;;  %v56_v31 = vmul.f32 %v468_v30, %v468_v30 }
  0x11   :  { %67 = vadd.xlane.f32.xlu2 %v46_v9  ;;  %63 = vadd.xlane.f32.xlu1 %v44_v10 }
  0x12   :  { %59 = vadd.xlane.f32.xlu0 %v42_v11 }
  0x19   :  { %73 = vadd.xlane.f32.xlu2 %v49_v15  ;;  %71 = vadd.xlane.f32.xlu1 %v48_v16 }
  0x1a   :  { %69 = vadd.xlane.f32.xlu0 %v47_v17 }
  0x21   :  { %79 = vadd.xlane.f32.xlu2 %v52_v21  ;;  %77 = vadd.xlane.f32.xlu1 %v51_v22 }
  0x22   :  { %75 = vadd.xlane.f32.xlu0 %v50_v23 }
  0x29   :  { %85 = vadd.xlane.f32.xlu2 %v55_v27  ;;  %83 = vadd.xlane.f32.xlu1 %v54_v28 }
  0x2a   :  { %81 = vadd.xlane.f32.xlu0 %v53_v29 }
  0x32   :  { %87 = vadd.xlane.f32.xlu0 %v56_v31 }
  0x7c   :  { %v66_v32 = vpop.xlane.xlu2 %65  ;;  %v62_v33 = vpop.xlane.xlu1 %61 }
  0x7d   :  { %304 = vrsqrt.f32 %v66_v32  ;;  %v58_v34 = vpop.xlane.xlu0 %57  ;;  %vm135_vm0 = vweird.f32 %v66_v32  ;;  %vm115_vm2 = vweird.f32 %v62_v33 }
  0x7e   :  { %306 = vrsqrt.f32 %v62_v33  ;;  %vm95_vm6 = vweird.f32 %v58_v34 }
  0x7f   :  { %308 = vrsqrt.f32 %v58_v34 }
  0x83   :  { %v305_v35 = vpop.eup %304 }
  0x84   :  { %v307_v36 = vpop.eup %306  ;;  %v130_v37 = vmul.f32 %v305_v35, %v66_v32  ;;  %v472_v38 = vpop.xlane.xlu2 %67  ;;  %vm136_vm1 = vweird.f32 %v305_v35 }
  0x85   :  { %v474_v39 = vpop.xlane.xlu1 %63  ;;  %v309_v40 = vpop.eup %308  ;;  %v110_v41 = vmul.f32 %v307_v36, %v62_v33  ;;  %310 = vrsqrt.f32 %v472_v38  ;;  %vm116_vm3 = vweird.f32 %v307_v36  ;;  %vm137_vm5 = vmor %vm135_vm0, %vm136_vm1  ;;  %vm145_vm9 = vweird.f32 %v472_v38 }
  0x86   :  { %v477_v42 = vpop.xlane.xlu0 %59  ;;  %v131_v43 = vmul.f32 %v305_v35, %v130_v37  ;;  %v90_v44 = vmul.f32 %v309_v40, %v58_v34  ;;  %312 = vrsqrt.f32 %v474_v39  ;;  %vm96_vm4 = vweird.f32 %v309_v40  ;;  %vm117_vm7 = vmor %vm115_vm2, %vm116_vm3 }
  0x87   :  { %v111_v45 = vmul.f32 %v307_v36, %v110_v41  ;;  %314 = vrsqrt.f32 %v477_v42  ;;  %vm97_vm8 = vmor %vm95_vm6, %vm96_vm4  ;;  %vm125_vm11 = vweird.f32 %v474_v39  ;;  %vm105_vm15 = vweird.f32 %v477_v42 }
  0x88   :  { %v132_v46 = vmul.f32 0.5, %v131_v43  ;;  %v91_v47 = vmul.f32 %v309_v40, %v90_v44 }
  0x89   :  { %v112_v48 = vmul.f32 0.5, %v111_v45 }
  0x8a   :  { %v133_v49 = vsub.f32 1.5, %v132_v46  ;;  %v92_v50 = vmul.f32 0.5, %v91_v47 }
  0x8b   :  { %v481_v51 = vpop.eup %310  ;;  %v113_v52 = vsub.f32 1.5, %v112_v48 }
  0x8c   :  { %v483_v53 = vpop.eup %312  ;;  %v134_v54 = vmul.f32 %v305_v35, %v133_v49  ;;  %v93_v55 = vsub.f32 1.5, %v92_v50  ;;  %v140_v56 = vmul.f32 %v481_v51, %v472_v38  ;;  %v487_v57 = vpop.xlane.xlu2 %73  ;;  %vm146_vm10 = vweird.f32 %v481_v51 }
  0x8d   :  { %v489_v58 = vpop.xlane.xlu1 %71  ;;  %v491_v59 = vpop.eup %314  ;;  %v114_v60 = vmul.f32 %v307_v36, %v113_v52  ;;  %v120_v61 = vmul.f32 %v483_v53, %v474_v39  ;;  %316 = vrsqrt.f32 %v487_v57  ;;  %vm126_vm12 = vweird.f32 %v483_v53  ;;  %vm147_vm14 = vmor %vm145_vm9, %vm146_vm10 }
  0x8e   :  { %v497_v62 = vpop.xlane.xlu0 %69  ;;  %v138_v63 = vsel %vm137_vm5, %v305_v35, %v134_v54  ;;  %v94_v3 = vmul.f32 %v309_v40, %v93_v55  ;;  %v141_v4 = vmul.f32 %v481_v51, %v140_v56  ;;  %v100_v5 = vmul.f32 %v491_v59, %v477_v42  ;;  %vm127_vm0 = vmor %vm125_vm11, %vm126_vm12 }
  0x8f   :  { %v253_v9 = vmul.f32 %v138_v63, %v408_v0  ;;  %v118_v10 = vsel %vm117_vm7, %v307_v36, %v114_v60  ;;  %v121_v11 = vmul.f32 %v483_v53, %v120_v61  ;;  %318 = vrsqrt.f32 %v489_v58 }
  0x90   :  { %v251_v15 = vmul.f32 %v118_v10, %v410_v1  ;;  %v98_v16 = vsel %vm97_vm8, %v309_v40, %v94_v3  ;;  %v142_v17 = vmul.f32 0.5, %v141_v4  ;;  %v101_v21 = vmul.f32 %v491_v59, %v100_v5 }
  0x91   :  { %269 = vst [vmem:[#allocation5 + $0x20] sm:$0xff] %v253_v9  ;;  %v249_v22 = vmul.f32 %v98_v16, %v412_v2  ;;  %v122_v23 = vmul.f32 0.5, %v121_v11  ;;  %320 = vrsqrt.f32 %v497_v62  ;;  %vm106_vm13 = vweird.f32 %v491_v59 }
  0x92   :  { %267 = vst [vmem:[#allocation5 + $0x10] sm:$0xff] %v251_v15  ;;  %v143_v0 = vsub.f32 1.5, %v142_v17  ;;  %v102_v27 = vmul.f32 0.5, %v101_v21  ;;  %vm107_vm1 = vmor %vm105_vm15, %vm106_vm13  ;;  %vm175_vm2 = vweird.f32 %v487_v57  ;;  %vm165_vm4 = vweird.f32 %v489_v58 }
  0x93   :  { %v514_v1 = vpop.eup %316  ;;  %265 = vst [vmem:[#allocation5] sm:$0xff] %v249_v22  ;;  %v123_v28 = vsub.f32 1.5, %v122_v23  ;;  %vm155_vm5 = vweird.f32 %v497_v62 }
  0x94   :  { %v144_v2 = vmul.f32 %v481_v51, %v143_v0  ;;  %v103_v29 = vsub.f32 1.5, %v102_v27  ;;  %v170_v31 = vmul.f32 %v514_v1, %v487_v57  ;;  %v522_v32 = vpop.xlane.xlu2 %79  ;;  %vm176_vm3 = vweird.f32 %v514_v1 }
  0x95   :  { %v524_v33 = vpop.xlane.xlu1 %77  ;;  %v124_v34 = vmul.f32 %v483_v53, %v123_v28  ;;  %322 = vrsqrt.f32 %v522_v32  ;;  %v537_v40 = vpop.eup %318  ;;  %vm205_vm6 = vweird.f32 %v522_v32  ;;  %vm177_vm8 = vmor %vm175_vm2, %vm176_vm3 }
  0x96   :  { %v531_v35 = vpop.xlane.xlu0 %75  ;;  %v148_v36 = vsel %vm147_vm14, %v481_v51, %v144_v2  ;;  %v104_v37 = vmul.f32 %v491_v59, %v103_v29  ;;  %v171_v39 = vmul.f32 %v514_v1, %v170_v31  ;;  %324 = vrsqrt.f32 %v524_v33 }
  0x97   :  { %v254_v38 = vmul.f32 %v148_v36, %v420_v6  ;;  %v128_v41 = vsel %vm127_vm0, %v483_v53, %v124_v34  ;;  %326 = vrsqrt.f32 %v531_v35  ;;  %v321_v42 = vpop.eup %320  ;;  %v160_v46 = vmul.f32 %v537_v40, %v489_v58 }
  0x98   :  { %v252_v43 = vmul.f32 %v128_v41, %v422_v7  ;;  %v108_v44 = vsel %vm107_vm1, %v491_v59, %v104_v37  ;;  %v172_v45 = vmul.f32 0.5, %v171_v39  ;;  %v150_v6 = vmul.f32 %v321_v42, %v497_v62 }
  0x99   :  { %270 = vst [vmem:[#allocation5 + $0x28] sm:$0xff] %v254_v38  ;;  %v250_v47 = vmul.f32 %v108_v44, %v424_v8  ;;  %v161_v49 = vmul.f32 %v537_v40, %v160_v46  ;;  %vm195_vm7 = vweird.f32 %v524_v33  ;;  %vm166_vm9 = vweird.f32 %v537_v40 }
  0x9a   :  { %268 = vst [vmem:[#allocation5 + $0x18] sm:$0xff] %v252_v43  ;;  %v173_v48 = vsub.f32 1.5, %v172_v45  ;;  %v151_v50 = vmul.f32 %v321_v42, %v150_v6  ;;  %vm156_vm10 = vweird.f32 %v321_v42  ;;  %vm167_vm12 = vmor %vm165_vm4, %vm166_vm9  ;;  %vm185_vm1 = vweird.f32 %v531_v35 }
  0x9b   :  { %v553_v7 = vpop.eup %322  ;;  %266 = vst [vmem:[#allocation5 + $0x8] sm:$0xff] %v250_v47  ;;  %v162_v52 = vmul.f32 0.5, %v161_v49  ;;  %vm157_vm14 = vmor %vm155_vm5, %vm156_vm10 }
  0x9c   :  { %v558_v8 = vpop.eup %324  ;;  %v174_v51 = vmul.f32 %v514_v1, %v173_v48  ;;  %v200_v53 = vmul.f32 %v553_v7, %v522_v32  ;;  %v564_v54 = vpop.xlane.xlu2 %85  ;;  %v152_v56 = vmul.f32 0.5, %v151_v50  ;;  %vm206_vm11 = vweird.f32 %v553_v7 }
  0x9d   :  { %v327_v55 = vpop.eup %326  ;;  %v190_v59 = vmul.f32 %v558_v8, %v524_v33  ;;  %328 = vrsqrt.f32 %v564_v54  ;;  %v163_v63 = vsub.f32 1.5, %v162_v52  ;;  %v579_v5 = vpop.xlane.xlu1 %83  ;;  %vm196_vm13 = vweird.f32 %v558_v8  ;;  %vm207_vm0 = vmor %vm205_vm6, %vm206_vm11 }
  0x9e   :  { %v574_v60 = vpop.xlane.xlu0 %81  ;;  %v178_v61 = vsel %vm177_vm8, %v514_v1, %v174_v51  ;;  %v201_v3 = vmul.f32 %v553_v7, %v200_v53  ;;  %v180_v4 = vmul.f32 %v327_v55, %v531_v35  ;;  %v153_v9 = vsub.f32 1.5, %v152_v56  ;;  %vm197_vm2 = vmor %vm195_vm7, %vm196_vm13 }
  0x9f   :  { %v257_v57 = vmul.f32 %v178_v61, %v432_v12  ;;  %v191_v10 = vmul.f32 %v558_v8, %v190_v59  ;;  %v164_v11 = vmul.f32 %v537_v40, %v163_v63  ;;  %330 = vrsqrt.f32 %v579_v5 }
  0xa0   :  { %v202_v15 = vmul.f32 0.5, %v201_v3  ;;  %v181_v16 = vmul.f32 %v327_v55, %v180_v4  ;;  %v154_v17 = vmul.f32 %v321_v42, %v153_v9  ;;  %332 = vrsqrt.f32 %v574_v60 }
  0xa1   :  { %273 = vst [vmem:[#allocation5 + $0x40] sm:$0xff] %v257_v57  ;;  %v192_v21 = vmul.f32 0.5, %v191_v10  ;;  %v168_v12 = vsel %vm167_vm12, %v537_v40, %v164_v11  ;;  %vm186_vm15 = vweird.f32 %v327_v55  ;;  %vm235_vm4 = vweird.f32 %v564_v54 }
  0xa2   :  { %v203_v22 = vsub.f32 1.5, %v202_v15  ;;  %v182_v23 = vmul.f32 0.5, %v181_v16  ;;  %v256_v27 = vmul.f32 %v168_v12, %v434_v13  ;;  %v158_v58 = vsel %vm157_vm14, %v321_v42, %v154_v17  ;;  %vm187_vm3 = vmor %vm185_vm1, %vm186_vm15 }
  0xa3   :  { %v329_v0 = vpop.eup %328  ;;  %v193_v1 = vsub.f32 1.5, %v192_v21  ;;  %v255_v28 = vmul.f32 %v158_v58, %v436_v14  ;;  %vm225_vm7 = vweird.f32 %v579_v5  ;;  %vm215_vm11 = vweird.f32 %v574_v60 }
  0xa4   :  { %v204_v2 = vmul.f32 %v553_v7, %v203_v22  ;;  %v183_v29 = vsub.f32 1.5, %v182_v23  ;;  %v230_v31 = vmul.f32 %v329_v0, %v564_v54  ;;  %272 = vst [vmem:[#allocation5 + $0x38] sm:$0xff] %v256_v27  ;;  %vm236_vm5 = vweird.f32 %v329_v0 }
  0xa5   :  { %v194_v62 = vmul.f32 %v558_v8, %v193_v1  ;;  %271 = vst [vmem:[#allocation5 + $0x30] sm:$0xff] %v255_v28  ;;  %v331_v37 = vpop.eup %330  ;;  %vm237_vm6 = vmor %vm235_vm4, %vm236_vm5 }
  0xa6   :  { %v88_v13 = vpop.xlane.xlu0 %87  ;;  %v208_v34 = vsel %vm207_vm0, %v553_v7, %v204_v2  ;;  %v184_v14 = vmul.f32 %v327_v55, %v183_v29  ;;  %v231_v36 = vmul.f32 %v329_v0, %v230_v31  ;;  %v333_v35 = vpop.eup %332  ;;  %v220_v42 = vmul.f32 %v331_v37, %v579_v5 }
  0xa7   :  { %334 = vrsqrt.f32 %v88_v13  ;;  %v260_v32 = vmul.f32 %v208_v34, %v444_v18  ;;  %v198_v39 = vsel %vm197_vm2, %v558_v8, %v194_v62  ;;  %v210_v43 = vmul.f32 %v333_v35, %v574_v60 }
  0xa8   :  { %v259_v40 = vmul.f32 %v198_v39, %v446_v19  ;;  %v188_v38 = vsel %vm187_vm3, %v327_v55, %v184_v14  ;;  %v232_v41 = vmul.f32 0.5, %v231_v36  ;;  %v221_v18 = vmul.f32 %v331_v37, %v220_v42 }
  0xa9   :  { %276 = vst [vmem:[#allocation5 + $0x58] sm:$0xff] %v260_v32  ;;  %v258_v33 = vmul.f32 %v188_v38, %v448_v20  ;;  %v211_v45 = vmul.f32 %v333_v35, %v210_v43  ;;  %vm226_vm8 = vweird.f32 %v331_v37  ;;  %vm216_vm9 = vweird.f32 %v333_v35 }
  0xaa   :  { %275 = vst [vmem:[#allocation5 + $0x50] sm:$0xff] %v259_v40  ;;  %v233_v44 = vsub.f32 1.5, %v232_v41  ;;  %v222_v19 = vmul.f32 0.5, %v221_v18  ;;  %vm227_vm10 = vmor %vm225_vm7, %vm226_vm8  ;;  %vm245_vm14 = vweird.f32 %v88_v13 }
  0xab   :  { %274 = vst [vmem:[#allocation5 + $0x48] sm:$0xff] %v258_v33  ;;  %v212_v6 = vmul.f32 0.5, %v211_v45  ;;  %vm217_vm12 = vmor %vm215_vm11, %vm216_vm9 }
  0xac   :  { %v234_v47 = vmul.f32 %v329_v0, %v233_v44  ;;  %v223_v7 = vsub.f32 1.5, %v222_v19 }
  0xad   :  { %v335_v46 = vpop.eup %334  ;;  %v213_v50 = vsub.f32 1.5, %v212_v6 }
  0xae   :  { %v240_v48 = vmul.f32 %v335_v46, %v88_v13  ;;  %v238_v49 = vsel %vm237_vm6, %v329_v0, %v234_v47  ;;  %v224_v51 = vmul.f32 %v331_v37, %v223_v7  ;;  %vm246_vm13 = vweird.f32 %v335_v46 }
  0xaf   :  { %v263_v20 = vmul.f32 %v238_v49, %v456_v24  ;;  %v214_v52 = vmul.f32 %v333_v35, %v213_v50  ;;  %vm247_vm15 = vmor %vm245_vm14, %vm246_vm13 }
  0xb0   :  { %v241_v8 = vmul.f32 %v335_v46, %v240_v48  ;;  %v228_v54 = vsel %vm227_vm10, %v331_v37, %v224_v51 }
  0xb1   :  { %279 = vst [vmem:[#allocation5 + $0x70] sm:$0xff] %v263_v20  ;;  %v262_v55 = vmul.f32 %v228_v54, %v458_v25  ;;  %v218_v56 = vsel %vm217_vm12, %v333_v35, %v214_v52 }
  0xb2   :  { %v242_v53 = vmul.f32 0.5, %v241_v8  ;;  %v261_v61 = vmul.f32 %v218_v56, %v460_v26 }
  0xb3   :  { %278 = vst [vmem:[#allocation5 + $0x68] sm:$0xff] %v262_v55 }
  0xb4   :  { %v243_v59 = vsub.f32 1.5, %v242_v53  ;;  %277 = vst [vmem:[#allocation5 + $0x60] sm:$0xff] %v261_v61 }
  0xb6   :  { %v244_v24 = vmul.f32 %v335_v46, %v243_v59 }
  0xb8   :  { %v248_v60 = vsel %vm247_vm15, %v335_v46, %v244_v24 }
  0xb9   :  { %v264_v63 = vmul.f32 %v248_v60, %v468_v30 }
  0xbb   :  { %280 = vst [vmem:[#allocation5 + $0x78] sm:$0xff] %v264_v63 }
  0xbc   :  { %293 = dma.vmem_to_hbm [thread:$0]  %s286_s13, 2048, %s288_s16, [#allocation4], %s389_s11, %s389_s11, %s390_s12  }
  0xbd   :  { %386 = dma.done.wait [#allocation4], 2048  }
  0xbe   :  { %387 = vsyncadd [#allocation4], 4294965248 }
  0xbf   :  { %298 = vsyncpa [#allocation3], 1 }
  0xc0   :  { %299 = vsyncpa [#allocation4], 1 }

</bundles_post_ra>
